<compile_context>
chip_gen: v7x
topology: tpu7x:2x2x1
jax: 0.10.0
libtpu: 0.0.40
codegen_flags: <defaults>
</compile_context>

<pallas_src>
import jax
import jax.numpy as jnp
from jax.experimental import pallas as pl
from jax.experimental.pallas import tpu as pltpu

HIDDEN = 32


def rnn_net_kernel(x_ref,      # (B*T, I)  batch-first, flattened input
                   h0_ref,     # (B, H)
                   wih_ref,    # (I, H)
                   whh_ref,    # (H, H)
                   bih_ref,    # (1, H)
                   bhh_ref,    # (1, H)
                   wout_ref,   # (1, H)    (same layout as PyTorch out.weight)
                   bout_ref,   # (1, 1)
                   out_ref,    # (B, T)    lane-dense, batch-first output
                   hT_ref):    # (B, H)    final hidden state
    """Elman RNN (tanh) over time + Linear(32 -> 1) on every timestep."""
    BT, I = x_ref.shape
    B, H = h0_ref.shape
    T = BT // B

    b = bih_ref[...] + bhh_ref[...]                     # (1, H) biases always sum

    # Hoisted input projection: one (B*T, I) @ (I, H) matmul + bias for all
    # timesteps.  Removes T-1 tiny matmuls from the serial recurrence chain.
    xw = (jnp.dot(x_ref[...], wih_ref[...],
                  preferred_element_type=jnp.float32)
          + b).reshape(B, T, H)                         # (B, T, H) value in vregs

    whh = whh_ref[...]                                  # (H, H)
    wout = wout_ref[...]                                # (1, H)
    bout = bout_ref[...]                                # (1, 1)

    # Serial recurrence, fully unrolled (T is static & small).  Each step is
    # one (B, H) @ (H, H) matmul + tanh (EUP); the per-step Linear output is a
    # VPU multiply + XLU lane reduction, so nothing but the recurrence touches
    # the MXU and no hidden-state history ever hits VMEM.
    h = h0_ref[...]                                     # (B, H)
    ys = []
    for t in range(T):
        h = jnp.tanh(xw[:, t, :]
                     + jnp.dot(h, whh, preferred_element_type=jnp.float32))
        ys.append(jnp.sum(h * wout, axis=-1, keepdims=True) + bout)   # (B, 1)

    out_ref[...] = jnp.concatenate(ys, axis=1)          # (B, T) lane-dense store
    hT_ref[...] = h


def net_forward(x, h_state, params):
    """Mirrors Net.forward(x, h_state) -> (outs, h_state)."""
    B, T, I = x.shape
    H = HIDDEN
    if h_state is None:
        h_state = jnp.zeros((1, B, H), jnp.float32)
    h0 = h_state.reshape(B, H)

    # Free contiguous reshape (batch-first preserved) -- no HBM transpose.
    x_flat = x.reshape(B * T, I)                        # (B*T, I)

    flops = 2 * B * T * (I * H + H * H + H)
    bytes_accessed = 4 * (B * T * I + 2 * B * H + I * H + H * H
                          + 2 * H + H + 1 + B * T)

    vmem = pl.BlockSpec(memory_space=pltpu.MemorySpace.VMEM)
    out_bt, hT = pl.pallas_call(
        rnn_net_kernel,
        out_shape=(jax.ShapeDtypeStruct((B, T), jnp.float32),
                   jax.ShapeDtypeStruct((B, H), jnp.float32)),
        in_specs=[vmem] * 8,
        out_specs=(vmem, vmem),
        cost_estimate=pl.CostEstimate(
            flops=flops,
            transcendentals=B * T * H,
            bytes_accessed=bytes_accessed),
    )(x_flat, h0,
      params["w_ih"], params["w_hh"], params["b_ih"], params["b_hh"],
      params["w_out"], params["b_out"])

    outs = out_bt[:, :, None]                           # (B, T, 1), free reshape
    return outs, hT.reshape(1, B, H)


def init_params(key, input_size, hidden=HIDDEN):
    """Deterministic init matching PyTorch parameter shapes."""
    ks = jax.random.split(key, 6)
    bound = 1.0 / jnp.sqrt(hidden)
    # PyTorch: weight_ih_l0 (H, I); we store its transpose (I, H), etc.
    w_ih = jax.random.uniform(ks[0], (input_size, hidden), jnp.float32, -bound, bound)
    w_hh = jax.random.uniform(ks[1], (hidden, hidden), jnp.float32, -bound, bound)
    b_ih = jax.random.uniform(ks[2], (1, hidden), jnp.float32, -bound, bound)
    b_hh = jax.random.uniform(ks[3], (1, hidden), jnp.float32, -bound, bound)
    # PyTorch: out.weight (1, H) -- stored as-is; out.bias scalar as (1, 1).
    w_out = jax.random.uniform(ks[4], (1, hidden), jnp.float32, -bound, bound)
    b_out = jax.random.uniform(ks[5], (1, 1), jnp.float32, -bound, bound)
    return dict(w_ih=w_ih, w_hh=w_hh, b_ih=b_ih, b_hh=b_hh,
                w_out=w_out, b_out=b_out)


def net_forward_ref(x, h_state, params):
    """Pure-JAX reference for correctness checking."""
    B, T, I = x.shape
    h = h_state.reshape(B, HIDDEN)
    b = params["b_ih"] + params["b_hh"]
    outs = []
    for t in range(T):
        h = jnp.tanh(x[:, t, :] @ params["w_ih"] + h @ params["w_hh"] + b)
        outs.append(h @ params["w_out"].T + params["b_out"])
    return jnp.stack(outs, axis=1), h.reshape(1, B, HIDDEN)


if __name__ == "__main__":
    B, T, INPUT_SIZE = 2, 8, 4

    key = jax.random.PRNGKey(0)
    kx, kh, kp = jax.random.split(key, 3)
    x = jax.random.normal(kx, (B, T, INPUT_SIZE), jnp.float32)
    h_state = jax.random.normal(kh, (1, B, HIDDEN), jnp.float32)
    params = init_params(kp, INPUT_SIZE)

    out, h_new = net_forward(x, h_state, params)
    out = jax.block_until_ready(out)
    h_new = jax.block_until_ready(h_new)

    # Sanity check against the pure-JAX reference.
    out_ref, h_ref = net_forward_ref(x, h_state, params)
    assert out.shape == (B, T, 1) and h_new.shape == (1, B, HIDDEN)
    assert jnp.allclose(out, out_ref, atol=1e-5), "output mismatch"
    assert jnp.allclose(h_new, h_ref, atol=1e-5), "hidden state mismatch"

    print("KERNEL_OK")
</pallas_src>

<mosaic_0001>
module attributes {stable_mosaic.version = 11 : i64} {
  func.func @rnn_net_kernel(%arg0: memref<16x4xf32, #tpu.memory_space<vmem>>, %arg1: memref<2x32xf32, #tpu.memory_space<vmem>>, %arg2: memref<4x32xf32, #tpu.memory_space<vmem>>, %arg3: memref<32x32xf32, #tpu.memory_space<vmem>>, %arg4: memref<1x32xf32, #tpu.memory_space<vmem>>, %arg5: memref<1x32xf32, #tpu.memory_space<vmem>>, %arg6: memref<1x32xf32, #tpu.memory_space<vmem>>, %arg7: memref<1x1xf32, #tpu.memory_space<vmem>>, %arg8: memref<2x8xf32, #tpu.memory_space<vmem>>, %arg9: memref<2x32xf32, #tpu.memory_space<vmem>>) attributes {dimension_semantics = [], scalar_prefetch = 0 : i64, scratch_operands = 0 : i64, tpu.core_type = #tpu.core_type<tc>} {
    %c0 = arith.constant 0 : index
    %c0_0 = arith.constant 0 : index
    %0 = vector.load %arg4[%c0, %c0_0] : memref<1x32xf32, #tpu.memory_space<vmem>>, vector<1x32xf32>
    %c0_1 = arith.constant 0 : index
    %c0_2 = arith.constant 0 : index
    %1 = vector.load %arg5[%c0_1, %c0_2] : memref<1x32xf32, #tpu.memory_space<vmem>>, vector<1x32xf32>
    %2 = arith.addf %0, %1 : vector<1x32xf32>
    %c0_3 = arith.constant 0 : index
    %c0_4 = arith.constant 0 : index
    %3 = vector.load %arg0[%c0_3, %c0_4] : memref<16x4xf32, #tpu.memory_space<vmem>>, vector<16x4xf32>
    %c0_5 = arith.constant 0 : index
    %c0_6 = arith.constant 0 : index
    %4 = vector.load %arg2[%c0_5, %c0_6] : memref<4x32xf32, #tpu.memory_space<vmem>>, vector<4x32xf32>
    %cst = arith.constant dense<0.000000e+00> : vector<16x32xf32>
    %5 = tpu.matmul %3, %4, %cst {dimension_numbers = #tpu.dot_dimension_numbers<[1], [0], [0], [1], [0, 0, 1, 1], [], []>} : vector<16x4xf32>, vector<4x32xf32>, vector<16x32xf32> -> vector<16x32xf32>
    %6 = vector.broadcast %2 : vector<1x32xf32> to vector<16x32xf32>
    %7 = arith.addf %5, %6 : vector<16x32xf32>
    %8 = vector.shape_cast %7 : vector<16x32xf32> to vector<2x8x32xf32>
    %c0_7 = arith.constant 0 : index
    %c0_8 = arith.constant 0 : index
    %9 = vector.load %arg3[%c0_7, %c0_8] : memref<32x32xf32, #tpu.memory_space<vmem>>, vector<32x32xf32>
    %c0_9 = arith.constant 0 : index
    %c0_10 = arith.constant 0 : index
    %10 = vector.load %arg6[%c0_9, %c0_10] : memref<1x32xf32, #tpu.memory_space<vmem>>, vector<1x32xf32>
    %c0_11 = arith.constant 0 : index
    %c0_12 = arith.constant 0 : index
    %11 = vector.load %arg7[%c0_11, %c0_12] : memref<1x1xf32, #tpu.memory_space<vmem>>, vector<1x1xf32>
    %c0_13 = arith.constant 0 : index
    %c0_14 = arith.constant 0 : index
    %12 = vector.load %arg1[%c0_13, %c0_14] : memref<2x32xf32, #tpu.memory_space<vmem>>, vector<2x32xf32>
    %13 = vector.extract_strided_slice %8 {offsets = [0, 0, 0], sizes = [2, 1, 32], strides = [1, 1, 1]} : vector<2x8x32xf32> to vector<2x1x32xf32>
    %14 = vector.shape_cast %13 : vector<2x1x32xf32> to vector<2x32xf32>
    %cst_15 = arith.constant dense<0.000000e+00> : vector<2x32xf32>
    %15 = tpu.matmul %12, %9, %cst_15 {dimension_numbers = #tpu.dot_dimension_numbers<[1], [0], [0], [1], [0, 0, 1, 1], [], []>} : vector<2x32xf32>, vector<32x32xf32>, vector<2x32xf32> -> vector<2x32xf32>
    %16 = arith.addf %14, %15 : vector<2x32xf32>
    %17 = math.tanh %16 : vector<2x32xf32>
    %18 = vector.broadcast %10 : vector<1x32xf32> to vector<2x32xf32>
    %19 = arith.mulf %17, %18 : vector<2x32xf32>
    %cst_16 = arith.constant dense<0.000000e+00> : vector<2xf32>
    %20 = vector.multi_reduction <add>, %19, %cst_16 [1] : vector<2x32xf32> to vector<2xf32>
    %21 = vector.shape_cast %20 : vector<2xf32> to vector<2x1xf32>
    %22 = vector.broadcast %11 : vector<1x1xf32> to vector<2x1xf32>
    %23 = arith.addf %21, %22 : vector<2x1xf32>
    %24 = vector.extract_strided_slice %8 {offsets = [0, 1, 0], sizes = [2, 1, 32], strides = [1, 1, 1]} : vector<2x8x32xf32> to vector<2x1x32xf32>
    %25 = vector.shape_cast %24 : vector<2x1x32xf32> to vector<2x32xf32>
    %cst_17 = arith.constant dense<0.000000e+00> : vector<2x32xf32>
    %26 = tpu.matmul %17, %9, %cst_17 {dimension_numbers = #tpu.dot_dimension_numbers<[1], [0], [0], [1], [0, 0, 1, 1], [], []>} : vector<2x32xf32>, vector<32x32xf32>, vector<2x32xf32> -> vector<2x32xf32>
    %27 = arith.addf %25, %26 : vector<2x32xf32>
    %28 = math.tanh %27 : vector<2x32xf32>
    %29 = vector.broadcast %10 : vector<1x32xf32> to vector<2x32xf32>
    %30 = arith.mulf %28, %29 : vector<2x32xf32>
    %cst_18 = arith.constant dense<0.000000e+00> : vector<2xf32>
    %31 = vector.multi_reduction <add>, %30, %cst_18 [1] : vector<2x32xf32> to vector<2xf32>
    %32 = vector.shape_cast %31 : vector<2xf32> to vector<2x1xf32>
    %33 = vector.broadcast %11 : vector<1x1xf32> to vector<2x1xf32>
    %34 = arith.addf %32, %33 : vector<2x1xf32>
    %35 = vector.extract_strided_slice %8 {offsets = [0, 2, 0], sizes = [2, 1, 32], strides = [1, 1, 1]} : vector<2x8x32xf32> to vector<2x1x32xf32>
    %36 = vector.shape_cast %35 : vector<2x1x32xf32> to vector<2x32xf32>
    %cst_19 = arith.constant dense<0.000000e+00> : vector<2x32xf32>
    %37 = tpu.matmul %28, %9, %cst_19 {dimension_numbers = #tpu.dot_dimension_numbers<[1], [0], [0], [1], [0, 0, 1, 1], [], []>} : vector<2x32xf32>, vector<32x32xf32>, vector<2x32xf32> -> vector<2x32xf32>
    %38 = arith.addf %36, %37 : vector<2x32xf32>
    %39 = math.tanh %38 : vector<2x32xf32>
    %40 = vector.broadcast %10 : vector<1x32xf32> to vector<2x32xf32>
    %41 = arith.mulf %39, %40 : vector<2x32xf32>
    %cst_20 = arith.constant dense<0.000000e+00> : vector<2xf32>
    %42 = vector.multi_reduction <add>, %41, %cst_20 [1] : vector<2x32xf32> to vector<2xf32>
    %43 = vector.shape_cast %42 : vector<2xf32> to vector<2x1xf32>
    %44 = vector.broadcast %11 : vector<1x1xf32> to vector<2x1xf32>
    %45 = arith.addf %43, %44 : vector<2x1xf32>
    %46 = vector.extract_strided_slice %8 {offsets = [0, 3, 0], sizes = [2, 1, 32], strides = [1, 1, 1]} : vector<2x8x32xf32> to vector<2x1x32xf32>
    %47 = vector.shape_cast %46 : vector<2x1x32xf32> to vector<2x32xf32>
    %cst_21 = arith.constant dense<0.000000e+00> : vector<2x32xf32>
    %48 = tpu.matmul %39, %9, %cst_21 {dimension_numbers = #tpu.dot_dimension_numbers<[1], [0], [0], [1], [0, 0, 1, 1], [], []>} : vector<2x32xf32>, vector<32x32xf32>, vector<2x32xf32> -> vector<2x32xf32>
    %49 = arith.addf %47, %48 : vector<2x32xf32>
    %50 = math.tanh %49 : vector<2x32xf32>
    %51 = vector.broadcast %10 : vector<1x32xf32> to vector<2x32xf32>
    %52 = arith.mulf %50, %51 : vector<2x32xf32>
    %cst_22 = arith.constant dense<0.000000e+00> : vector<2xf32>
    %53 = vector.multi_reduction <add>, %52, %cst_22 [1] : vector<2x32xf32> to vector<2xf32>
    %54 = vector.shape_cast %53 : vector<2xf32> to vector<2x1xf32>
    %55 = vector.broadcast %11 : vector<1x1xf32> to vector<2x1xf32>
    %56 = arith.addf %54, %55 : vector<2x1xf32>
    %57 = vector.extract_strided_slice %8 {offsets = [0, 4, 0], sizes = [2, 1, 32], strides = [1, 1, 1]} : vector<2x8x32xf32> to vector<2x1x32xf32>
    %58 = vector.shape_cast %57 : vector<2x1x32xf32> to vector<2x32xf32>
    %cst_23 = arith.constant dense<0.000000e+00> : vector<2x32xf32>
    %59 = tpu.matmul %50, %9, %cst_23 {dimension_numbers = #tpu.dot_dimension_numbers<[1], [0], [0], [1], [0, 0, 1, 1], [], []>} : vector<2x32xf32>, vector<32x32xf32>, vector<2x32xf32> -> vector<2x32xf32>
    %60 = arith.addf %58, %59 : vector<2x32xf32>
    %61 = math.tanh %60 : vector<2x32xf32>
    %62 = vector.broadcast %10 : vector<1x32xf32> to vector<2x32xf32>
    %63 = arith.mulf %61, %62 : vector<2x32xf32>
    %cst_24 = arith.constant dense<0.000000e+00> : vector<2xf32>
    %64 = vector.multi_reduction <add>, %63, %cst_24 [1] : vector<2x32xf32> to vector<2xf32>
    %65 = vector.shape_cast %64 : vector<2xf32> to vector<2x1xf32>
    %66 = vector.broadcast %11 : vector<1x1xf32> to vector<2x1xf32>
    %67 = arith.addf %65, %66 : vector<2x1xf32>
    %68 = vector.extract_strided_slice %8 {offsets = [0, 5, 0], sizes = [2, 1, 32], strides = [1, 1, 1]} : vector<2x8x32xf32> to vector<2x1x32xf32>
    %69 = vector.shape_cast %68 : vector<2x1x32xf32> to vector<2x32xf32>
    %cst_25 = arith.constant dense<0.000000e+00> : vector<2x32xf32>
    %70 = tpu.matmul %61, %9, %cst_25 {dimension_numbers = #tpu.dot_dimension_numbers<[1], [0], [0], [1], [0, 0, 1, 1], [], []>} : vector<2x32xf32>, vector<32x32xf32>, vector<2x32xf32> -> vector<2x32xf32>
    %71 = arith.addf %69, %70 : vector<2x32xf32>
    %72 = math.tanh %71 : vector<2x32xf32>
    %73 = vector.broadcast %10 : vector<1x32xf32> to vector<2x32xf32>
    %74 = arith.mulf %72, %73 : vector<2x32xf32>
    %cst_26 = arith.constant dense<0.000000e+00> : vector<2xf32>
    %75 = vector.multi_reduction <add>, %74, %cst_26 [1] : vector<2x32xf32> to vector<2xf32>
    %76 = vector.shape_cast %75 : vector<2xf32> to vector<2x1xf32>
    %77 = vector.broadcast %11 : vector<1x1xf32> to vector<2x1xf32>
    %78 = arith.addf %76, %77 : vector<2x1xf32>
    %79 = vector.extract_strided_slice %8 {offsets = [0, 6, 0], sizes = [2, 1, 32], strides = [1, 1, 1]} : vector<2x8x32xf32> to vector<2x1x32xf32>
    %80 = vector.shape_cast %79 : vector<2x1x32xf32> to vector<2x32xf32>
    %cst_27 = arith.constant dense<0.000000e+00> : vector<2x32xf32>
    %81 = tpu.matmul %72, %9, %cst_27 {dimension_numbers = #tpu.dot_dimension_numbers<[1], [0], [0], [1], [0, 0, 1, 1], [], []>} : vector<2x32xf32>, vector<32x32xf32>, vector<2x32xf32> -> vector<2x32xf32>
    %82 = arith.addf %80, %81 : vector<2x32xf32>
    %83 = math.tanh %82 : vector<2x32xf32>
    %84 = vector.broadcast %10 : vector<1x32xf32> to vector<2x32xf32>
    %85 = arith.mulf %83, %84 : vector<2x32xf32>
    %cst_28 = arith.constant dense<0.000000e+00> : vector<2xf32>
    %86 = vector.multi_reduction <add>, %85, %cst_28 [1] : vector<2x32xf32> to vector<2xf32>
    %87 = vector.shape_cast %86 : vector<2xf32> to vector<2x1xf32>
    %88 = vector.broadcast %11 : vector<1x1xf32> to vector<2x1xf32>
    %89 = arith.addf %87, %88 : vector<2x1xf32>
    %90 = vector.extract_strided_slice %8 {offsets = [0, 7, 0], sizes = [2, 1, 32], strides = [1, 1, 1]} : vector<2x8x32xf32> to vector<2x1x32xf32>
    %91 = vector.shape_cast %90 : vector<2x1x32xf32> to vector<2x32xf32>
    %cst_29 = arith.constant dense<0.000000e+00> : vector<2x32xf32>
    %92 = tpu.matmul %83, %9, %cst_29 {dimension_numbers = #tpu.dot_dimension_numbers<[1], [0], [0], [1], [0, 0, 1, 1], [], []>} : vector<2x32xf32>, vector<32x32xf32>, vector<2x32xf32> -> vector<2x32xf32>
    %93 = arith.addf %91, %92 : vector<2x32xf32>
    %94 = math.tanh %93 : vector<2x32xf32>
    %95 = vector.broadcast %10 : vector<1x32xf32> to vector<2x32xf32>
    %96 = arith.mulf %94, %95 : vector<2x32xf32>
    %cst_30 = arith.constant dense<0.000000e+00> : vector<2xf32>
    %97 = vector.multi_reduction <add>, %96, %cst_30 [1] : vector<2x32xf32> to vector<2xf32>
    %98 = vector.shape_cast %97 : vector<2xf32> to vector<2x1xf32>
    %99 = vector.broadcast %11 : vector<1x1xf32> to vector<2x1xf32>
    %100 = arith.addf %98, %99 : vector<2x1xf32>
    %101 = tpu.concatenate %23, %34, %45, %56, %67, %78, %89, %100 in 1 : vector<2x1xf32>, vector<2x1xf32>, vector<2x1xf32>, vector<2x1xf32>, vector<2x1xf32>, vector<2x1xf32>, vector<2x1xf32>, vector<2x1xf32> -> vector<2x8xf32>
    %c0_31 = arith.constant 0 : index
    %c0_32 = arith.constant 0 : index
    %102 = vector.load %arg8[%c0_31, %c0_32] : memref<2x8xf32, #tpu.memory_space<vmem>>, vector<2x8xf32>
    tpu.vector_store %arg8[%c0_31, %c0_32], %101 {strides = array<i32>} : memref<2x8xf32, #tpu.memory_space<vmem>>, vector<2x8xf32>,
    %c0_33 = arith.constant 0 : index
    %c0_34 = arith.constant 0 : index
    %103 = vector.load %arg9[%c0_33, %c0_34] : memref<2x32xf32, #tpu.memory_space<vmem>>, vector<2x32xf32>
    tpu.vector_store %arg9[%c0_33, %c0_34], %94 {strides = array<i32>} : memref<2x32xf32, #tpu.memory_space<vmem>>, vector<2x32xf32>,
    return
  }
}

</mosaic_0001>

<bundles_post_ra>
// kernel: tpu_custom_call.1
= control target key start
LH: loop header
LB: loop body
LE: loop exit
PB: predicated region body
PF: predicated region fallthrough
CT: control target
= control target key end

     0   :  { %s1601_s0 = inlined_call_operand.vmem [shape: f32[16,4], index: 0, kind: input, shape index: {}]   ;;  %s1602_s1 = inlined_call_operand.vmem [shape: f32[2,32], index: 1, kind: input, shape index: {}]   ;;  %s1603_s2 = inlined_call_operand.hbm [shape: f32[4,32], index: 2, kind: input, shape index: {}]   ;;  %s1604_s3 = inlined_call_operand.vmem [shape: f32[32,32], index: 3, kind: input, shape index: {}]   ;;  %s1605_s4 = inlined_call_operand.vmem [shape: f32[1,32], index: 4, kind: input, shape index: {}]   ;;  %s1606_s5 = inlined_call_operand.vmem [shape: f32[1,32], index: 5, kind: input, shape index: {}]   ;;  %s1607_s6 = inlined_call_operand.vmem [shape: f32[1,32], index: 6, kind: input, shape index: {}]   ;;  %s1608_s7 = inlined_call_operand.<no memory space> [shape: f32[1,1], index: 7, kind: input, shape index: {}]   ;;  %s1609_s8 = inlined_call_operand.hbm [shape: f32[2,8], index: 8, kind: output, shape index: {0}]   ;;  %s1610_s9 = inlined_call_operand.hbm [shape: f32[2,32], index: 9, kind: output, shape index: {1}]  }
   0x1   :  { %v15_v0 = vstv %s1608_s7 }
   0x2   :  { %16 = vst [vmem:[#allocation2] sm:$0x1] %v15_v0 }
   0x3   :  { %17 = vsyncpa [#allocation4], 0 }
   0x4   :  { %18 = vsyncpa [#allocation5], 0 }
   0x5   :  { %19 = vsyncpa [#allocation8], 0  ;;  %s1357_s11 = smov [#allocation3]   ;;  %s1285_s15 = scalar_lea.hbm %s1603_s2, 64 }
   0x6   :  { %s30_s12 = sshll.u32 %s1357_s11, 4  ;;  %p1286_p0 = scmp.ne.s32.totalorder %s1603_s2, %s1285_s15  ;;  %s31_s12 = int_to_ptr.vmem [resolvable:$true] %s30_s12 }
   0x7   :  { %p1289_p1 = scmp.lt.u32.totalorder %s1285_s15, %s1603_s2 }
   0x9   :  { %p1291_p2 = pnand %p1289_p1, %p1286_p0 }
   0xb   :  { %1294 = shalt.err (!%p1291_p2)
}
   0xc   :  { %s1295_s7 = scalar_lea.vmem %s31_s12, 64  ;;  %p1300_p4 = scmp.lt.s32.totalorder %s31_s12, %s31_s12 }
   0xd   :  { %p1296_p3 = scmp.ne.s32.totalorder %s31_s12, %s1295_s7  ;;  %p1301_p5 = scmp.lt.s32.totalorder %s1295_s7, %s1295_s7 }
   0xf   :  { %p1302_p6 = por %p1301_p5, %p1300_p4 }
  0x11   :  { %p1303_p7 = pnand %p1302_p6, %p1296_p3 }
  0x13   :  { %1306 = shalt.err (!%p1303_p7)
}
  0x14   :  { %33 = dma.hbm_to_vmem [thread:$0]  %s1603_s2, 64, %s31_s12, [#allocation4]  }
  0x15   :  { %1351 = dma.done.wait [#allocation4], 64  }
  0x16   :  { %1352 = vsyncadd [#allocation4], 4294967232  ;;  %v1358_v1 = vmov 0.0|0.0   ;;  %vm1359_vm0 = vmmov 0   ;;  %v1360_v2 = vmov 0.0   ;;  %vm66_vm1 = vcmask 1043456  }
  0x17   :  { %1192 = vmatprep.subr.bf16.mxu1 %v1358_v1  ;;  %1112 = vmatprep.mubr.msk.f32.mxu1 %vm1359_vm0, %v1360_v2  ;;  %vm59_vm2 = vcmask 31744   ;;  %v145_v3 = vld [vmem:[%s1604_s3] sm:$0xff]  ;;  %v146_v4 = vld [vmem:[%s1604_s3 + $0x8] sm:$0xff]  ;;  %v147_v9 = vld [vmem:[%s1604_s3 + $0x10] sm:$0xff]  ;;  %vm152_vm3 = vcmask 261120   ;;  %v54_v13 = vlaneseq  ;;  %vm245_vm4 = vcmask 1041409  }
  0x18   :  { %v52_v5 = vld [vmem:[#allocation3] sm:$0xf]  ;;  %v1444_v6 = vpack.c.bf16 %v146_v4, %v145_v3  ;;  %v51_v8 = vld [vmem:[%s1601_s0 + $0x8] sm:$0xff]  ;;  %v148_v10 = vld [vmem:[%s1604_s3 + $0x18] sm:$0xff]  ;;  %vm348_vm5 = vcmask 1042434   ;;  %vm351_vm6 = vcmask 256001  }
  0x19   :  { %1099 = vmatprep.subr.msk.mxu0 %vm66_vm1, %v52_v5  ;;  %v50_v7 = vld [vmem:[%s1601_s0] sm:$0xff]  ;;  %v1461_v11 = vpack.c.bf16 %v148_v10, %v147_v9  ;;  %v55_v14 = vshrl.u32 %v54_v13, 7  ;;  %vm446_vm7 = vcmask 1043459   ;;  %vm449_vm8 = vcmask 257026   ;;  %s1362_s15 = smov 3   ;;  %s1363_s16 = smov 2  }
  0x1a   :  { %1100 = vmatpush3.msk.msra.mxu0 %vm66_vm1, %v52_v5  ;;  %1101 = vmatprep.mubr.msk.f32.mxu0 %vm59_vm2, %v50_v7  ;;  %v151_v12 = vld [vmem:[%s1602_s1] sm:$0x3]  ;;  %vm545_vm9 = vcmask 1044484   ;;  %vm548_vm10 = vcmask 258051   ;;  %vm644_vm11 = vcmask 1045509   ;;  %vm647_vm12 = vcmask 259076  }
  0x1b   :  { %1194 = vmatpush3.bf16.msra.mxu1 %v1444_v6  ;;  %1102 = vmatmul.mubr.msk.f32.vlgmr.msra.gmra.mrb[0].mxu0 %vm59_vm2, %v51_v8  ;;  %v47_v15 = vld [vmem:[%s1605_s4] sm:$0x1]  ;;  %v56_v18 = vsub.s32 0, %v55_v14  ;;  %vm743_vm13 = vcmask 1046534   ;;  %vm746_vm14 = vcmask 260101   ;;  %vm842_vm15 = vcmask 1047559  }
  0x1c   :  { %1195 = vmatprep.subr.bf16.mxu1 %v1358_v1  ;;  %1198 = vmatprep.subr.bf16.mxu0 %v1358_v1  ;;  %v48_v16 = vld [vmem:[%s1606_s5] sm:$0x1]  ;;  %vm943_vm1 = vcmask 261127   ;;  %s1364_s17 = smov 4   ;;  %s1365_s18 = smov 6  }
  0x1d   :  { %1200 = vmatpush3.bf16.msra.mxu0 %v1444_v6  ;;  %1123 = vmatprep.mubr.msk.f32.mxu0 %vm1359_vm0, %v1360_v2  ;;  %v49_v17 = vadd.f32 %v48_v16, %v47_v15  ;;  %v1498_v31 = vld [vmem:[%s1607_s6] ss:$0 sm:$0xff]  ;;  %s1361_s6 = smov 1   ;;  %s1366_s19 = smov 5  }
  0x1e   :  { %1201 = vmatprep.subr.bf16.mxu0 %v1358_v1  ;;  %s1367_s7 = smov [#allocation7]  }
  0x1f   :  { %1197 = vmatpush3.bf16.msra.mxu1 %v1461_v11  ;;  %v57_v19 = vrot.slane %v49_v17, %v56_v18  ;;  %s1030_s20 = sshll.u32 %s1367_s7, 4  ;;  %s1031_s20 = int_to_ptr.vmem [resolvable:$true] %s1030_s20 }
  0x20   :  { %1204 = vmatprep.subr.bf16.mxu1 %v1358_v1  ;;  %s1307_s21 = scalar_lea.vmem %s1031_s20, 32  ;;  %p1312_p9 = scmp.lt.s32.totalorder %s1031_s20, %s1031_s20 }
  0x21   :  { %1203 = vmatpush3.bf16.msra.mxu0 %v1461_v11  ;;  %p1308_p8 = scmp.ne.s32.totalorder %s1031_s20, %s1307_s21  ;;  %p1313_p10 = scmp.lt.s32.totalorder %s1307_s21, %s1307_s21 }
  0x22   :  { %1113 = vmatmul.mubr.msk.f32.vlgmr.msra.gmra.mrb[0].mxu1 %vm152_vm3, %v151_v12  ;;  %1210 = vmatprep.subr.bf16.mxu0 %v1358_v1 }
  0x23   :  { %1206 = vmatpush3.bf16.msra.mxu1 %v1444_v6  ;;  %1134 = vmatprep.mubr.msk.f32.mxu1 %vm1359_vm0, %v1360_v2  ;;  %p1314_p11 = por %p1313_p10, %p1312_p9 }
  0x24   :  { %1207 = vmatprep.subr.bf16.mxu1 %v1358_v1 }
  0x25   :  { %p1315_p12 = pnand %p1314_p11, %p1308_p8 }
  0x27   :  { %1209 = vmatpush3.bf16.msra.mxu1 %v1461_v11 }
  0x28   :  { %1216 = vmatprep.subr.bf16.mxu1 %v1358_v1 }
  0xee   :  { %v1103_v20 = vpop.f32.mrb[0].mxu0 }
  0xef   :  { %v136_v21 = vpop.f32.mrb[1].mxu0  ;;  %v1491_v23 = vadd.f32 %v1103_v20, %v57_v19 }
  0xf0   :  { %v1489_v22 = vadd.f32 %v136_v21, %v57_v19 }
  0xf5   :  { %v222_v24 = vpop.f32.mrb[0].mxu1 }
  0xf6   :  { %v227_v25 = vrot.slane %v222_v24, 1  ;;  %v230_v26 = vadd.f32 %v222_v24, %v1489_v22  ;;  %v1114_v27 = vpop.f32.mrb[1].mxu1 }
  0xf8   :  { %v231_v28 = vadd.f32 %v227_v25, %v1491_v23  ;;  %1253 = vtanh.f32 %v230_v26 }
  0xfa   :  { %1255 = vtanh.f32 %v231_v28 }
 0x102   :  { %v1254_v29 = vpop.eup %1253 }
 0x103   :  { %v240_v35 = vmul.f32 %v1254_v29, %v1498_v31 }
 0x104   :  { %v1256_v30 = vpop.eup %1255 }
 0x105   :  { %v261_v32 = vrot.slane %v1256_v30, 7  ;;  %v241_v33 = vmul.f32 %v1256_v30, %v1498_v31 }
 0x107   :  { %v262_v34 = vsel %vm245_vm4, %v261_v32, %v1254_v29  ;;  %v244_v36 = vrot.slane %v241_v33, 7 }
 0x108   :  { %1124 = vmatmul.mubr.msk.f32.vlgmr.msra.gmra.mrb[2].mxu0 %vm152_vm3, %v262_v34 }
 0x109   :  { %1212 = vmatpush3.bf16.msra.mxu0 %v1444_v6  ;;  %1145 = vmatprep.mubr.msk.f32.mxu0 %vm1359_vm0, %v1360_v2  ;;  %v1508_v37 = vsel %vm245_vm4, %v244_v36, %v240_v35 }
 0x10a   :  { %1213 = vmatprep.subr.bf16.mxu0 %v1358_v1 }
 0x10d   :  { %1215 = vmatpush3.bf16.msra.mxu0 %v1461_v11 }
 0x10e   :  { %1222 = vmatprep.subr.bf16.mxu0 %v1358_v1 }
 0x1db   :  { %v331_v38 = vpop.f32.mrb[2].mxu0 }
 0x1dc   :  { %v336_v39 = vrot.slane %v331_v38, 7  ;;  %v340_v40 = vadd.f32 %v331_v38, %v1491_v23  ;;  %v1125_v41 = vpop.f32.mrb[3].mxu0 }
 0x1de   :  { %v339_v42 = vadd.f32 %v336_v39, %v1489_v22  ;;  %1257 = vtanh.f32 %v340_v40 }
 0x1e0   :  { %1259 = vtanh.f32 %v339_v42 }
 0x1e8   :  { %v1258_v43 = vpop.eup %1257 }
 0x1e9   :  { %v344_v44 = vmul.f32 %v1258_v43, %v1498_v31 }
 0x1ea   :  { %v1260_v45 = vpop.eup %1259 }
 0x1eb   :  { %v358_v46 = vrot.slane %v1260_v45, 1  ;;  %v343_v47 = vmul.f32 %v1260_v45, %v1498_v31  ;;  %v347_v48 = vrot.slane %v344_v44, 7 }
 0x1ed   :  { %v359_v49 = vsel %vm245_vm4, %v1258_v43, %v358_v46  ;;  %v349_v50 = vsel %vm348_vm5, %v347_v48, %v343_v47 }
 0x1ee   :  { %1135 = vmatmul.mubr.msk.f32.vlgmr.msra.gmra.mrb[2].mxu1 %vm152_vm3, %v359_v49  ;;  %v352_v51 = vsel %vm351_vm6, %v349_v50, 0.0 }
 0x1ef   :  { %353 = vadd.xlane.f32.xlu0 %v352_v51  ;;  %1218 = vmatpush3.bf16.msra.mxu1 %v1444_v6 }
 0x1f0   :  { %1219 = vmatprep.subr.bf16.mxu1 %v1358_v1  ;;  %1156 = vmatprep.mubr.msk.f32.mxu1 %vm1359_vm0, %v1360_v2 }
 0x1f3   :  { %1221 = vmatpush3.bf16.msra.mxu1 %v1461_v11 }
 0x1f4   :  { %1228 = vmatprep.subr.bf16.mxu1 %v1358_v1 }
 0x2c1   :  { %v428_v52 = vpop.f32.mrb[2].mxu1 }
 0x2c2   :  { %v433_v53 = vrot.slane %v428_v52, 6  ;;  %v434_v54 = vrot.slane %v428_v52, 7  ;;  %v1136_v55 = vpop.f32.mrb[3].mxu1 }
 0x2c4   :  { %v437_v56 = vadd.f32 %v433_v53, %v1489_v22  ;;  %v438_v57 = vadd.f32 %v434_v54, %v1491_v23 }
 0x2c6   :  { %1261 = vtanh.f32 %v437_v56 }
 0x2c7   :  { %1263 = vtanh.f32 %v438_v57 }
 0x2d0   :  { %v1262_v58 = vpop.eup %1261 }
 0x2d1   :  { %v1264_v59 = vpop.eup %1263  ;;  %v456_v60 = vrot.slane %v1262_v58, 2  ;;  %v441_v0 = vmul.f32 %v1262_v58, %v1498_v31 }
 0x2d2   :  { %v457_v61 = vrot.slane %v1264_v59, 1  ;;  %v442_v62 = vmul.f32 %v1264_v59, %v1498_v31 }
 0x2d4   :  { %v458_v63 = vsel %vm245_vm4, %v457_v61, %v456_v60  ;;  %v445_v3 = vrot.slane %v442_v62, 7 }
 0x2d5   :  { %1146 = vmatmul.mubr.msk.f32.vlgmr.msra.gmra.mrb[4].mxu0 %vm152_vm3, %v458_v63 }
 0x2d6   :  { %v447_v4 = vsel %vm446_vm7, %v445_v3, %v441_v0  ;;  %1224 = vmatpush3.bf16.msra.mxu0 %v1444_v6  ;;  %1167 = vmatprep.mubr.msk.f32.mxu0 %vm1359_vm0, %v1360_v2 }
 0x2d7   :  { %v450_v5 = vsel %vm449_vm8, %v447_v4, 0.0  ;;  %1225 = vmatprep.subr.bf16.mxu0 %v1358_v1 }
 0x2d8   :  { %451 = vadd.xlane.f32.xlu0 %v450_v5 }
 0x2da   :  { %1227 = vmatpush3.bf16.msra.mxu0 %v1461_v11 }
 0x2db   :  { %1234 = vmatprep.subr.bf16.mxu0 %v1358_v1 }
 0x3a8   :  { %v527_v7 = vpop.f32.mrb[4].mxu0 }
 0x3a9   :  { %v532_v8 = vrot.slane %v527_v7, 5  ;;  %v533_v9 = vrot.slane %v527_v7, 6  ;;  %v1147_v10 = vpop.f32.mrb[5].mxu0 }
 0x3ab   :  { %v536_v12 = vadd.f32 %v532_v8, %v1489_v22  ;;  %v537_v13 = vadd.f32 %v533_v9, %v1491_v23 }
 0x3ad   :  { %1265 = vtanh.f32 %v536_v12 }
 0x3ae   :  { %1267 = vtanh.f32 %v537_v13 }
 0x3b7   :  { %v1266_v14 = vpop.eup %1265 }
 0x3b8   :  { %v1268_v15 = vpop.eup %1267  ;;  %v555_v16 = vrot.slane %v1266_v14, 3  ;;  %v540_v20 = vmul.f32 %v1266_v14, %v1498_v31 }
 0x3b9   :  { %v556_v17 = vrot.slane %v1268_v15, 2  ;;  %v541_v18 = vmul.f32 %v1268_v15, %v1498_v31 }
 0x3bb   :  { %v557_v19 = vsel %vm245_vm4, %v556_v17, %v555_v16  ;;  %v544_v21 = vrot.slane %v541_v18, 7 }
 0x3bc   :  { %1157 = vmatmul.mubr.msk.f32.vlgmr.msra.gmra.mrb[4].mxu1 %vm152_vm3, %v557_v19 }
 0x3bd   :  { %v546_v24 = vsel %vm545_vm9, %v544_v21, %v540_v20  ;;  %1230 = vmatpush3.bf16.msra.mxu1 %v1444_v6  ;;  %1178 = vmatprep.mubr.msk.f32.mxu1 %vm1359_vm0, %v1360_v2 }
 0x3be   :  { %v549_v25 = vsel %vm548_vm10, %v546_v24, 0.0  ;;  %1231 = vmatprep.subr.bf16.mxu1 %v1358_v1 }
 0x3bf   :  { %550 = vadd.xlane.f32.xlu1 %v549_v25 }
 0x3c1   :  { %1233 = vmatpush3.bf16.msra.mxu1 %v1461_v11 }
 0x48f   :  { %v626_v26 = vpop.f32.mrb[4].mxu1 }
 0x490   :  { %v631_v27 = vrot.slane %v626_v26, 4  ;;  %v632_v28 = vrot.slane %v626_v26, 5  ;;  %v1158_v29 = vpop.f32.mrb[5].mxu1 }
 0x491   :  { %v551_v29 = vpop.xlane.xlu1 %550 }
 0x492   :  { %v635_v30 = vadd.f32 %v631_v27, %v1489_v22  ;;  %v636_v32 = vadd.f32 %v632_v28, %v1491_v23  ;;  %v1048_v27 = vld [vmem:[#allocation2] ss:$0 sm:$0xff]  ;;  %v354_v28 = vpop.xlane.xlu0 %353 }
 0x494   :  { %1269 = vtanh.f32 %v635_v30  ;;  %v355_v30 = vadd.f32 %v1048_v27, %v354_v28 }
 0x495   :  { %1271 = vtanh.f32 %v636_v32 }
 0x496   :  { %v452_v32 = vpop.xlane.xlu0 %451 }
 0x49e   :  { %v1270_v33 = vpop.eup %1269 }
 0x49f   :  { %v1272_v34 = vpop.eup %1271  ;;  %v654_v35 = vrot.slane %v1270_v33, 4  ;;  %v639_v40 = vmul.f32 %v1270_v33, %v1498_v31 }
 0x4a0   :  { %v655_v36 = vrot.slane %v1272_v34, 3  ;;  %v640_v38 = vmul.f32 %v1272_v34, %v1498_v31  ;;  %v954_v34 = vrot.slane %v355_v30, 1 }
 0x4a2   :  { %v656_v39 = vsel %vm245_vm4, %v655_v36, %v654_v35  ;;  %v643_v41 = vrot.slane %v640_v38, 7  ;;  %v552_v35 = vadd.f32 %v1048_v27, %v551_v29 }
 0x4a3   :  { %1168 = vmatmul.mubr.msk.f32.vlgmr.msra.gmra.mrb[6].mxu0 %vm152_vm3, %v656_v39 }
 0x4a4   :  { %v645_v42 = vsel %vm644_vm11, %v643_v41, %v639_v40  ;;  %1236 = vmatpush3.bf16.msra.mxu0 %v1444_v6  ;;  %1189 = vmatprep.mubr.msk.f32.mxu0 %vm1359_vm0, %v1360_v2  ;;  %vm845_vm0 = vcmask 261126   ;;  %v964_v38 = vrot.slane %v552_v35, 3 }
 0x4a5   :  { %v648_v43 = vsel %vm647_vm12, %v645_v42, 0.0  ;;  %1237 = vmatprep.subr.bf16.mxu0 %v1358_v1 }
 0x4a6   :  { %649 = vadd.xlane.f32.xlu1 %v648_v43 }
 0x4a8   :  { %1239 = vmatpush3.bf16.msra.mxu0 %v1461_v11 }
 0x533   :  { %v650_v33 = vpop.xlane.xlu1 %649 }
 0x534   :  { %v651_v39 = vadd.f32 %v1048_v27, %v650_v33 }
 0x576   :  { %v725_v44 = vpop.f32.mrb[6].mxu0 }
 0x577   :  { %v730_v45 = vrot.slane %v725_v44, 3  ;;  %v731_v46 = vrot.slane %v725_v44, 4  ;;  %v1169_v47 = vpop.f32.mrb[7].mxu0 }
 0x579   :  { %v734_v48 = vadd.f32 %v730_v45, %v1489_v22  ;;  %v735_v49 = vadd.f32 %v731_v46, %v1491_v23 }
 0x57b   :  { %1273 = vtanh.f32 %v734_v48 }
 0x57c   :  { %1275 = vtanh.f32 %v735_v49 }
 0x585   :  { %v1274_v6 = vpop.eup %1273 }
 0x586   :  { %v1276_v50 = vpop.eup %1275  ;;  %v753_v51 = vrot.slane %v1274_v6, 5  ;;  %v738_v11 = vmul.f32 %v1274_v6, %v1498_v31 }
 0x587   :  { %v754_v2 = vrot.slane %v1276_v50, 4  ;;  %v739_v52 = vmul.f32 %v1276_v50, %v1498_v31 }
 0x589   :  { %v755_v1 = vsel %vm245_vm4, %v754_v2, %v753_v51  ;;  %v742_v53 = vrot.slane %v739_v52, 7 }
 0x58a   :  { %1179 = vmatmul.mubr.msk.f32.vlgmr.msra.gmra.mrb[6].mxu1 %vm152_vm3, %v755_v1 }
 0x58b   :  { %v744_v54 = vsel %vm743_vm13, %v742_v53, %v738_v11 }
 0x58c   :  { %v747_v55 = vsel %vm746_vm14, %v744_v54, 0.0 }
 0x58d   :  { %748 = vadd.xlane.f32.xlu0 %v747_v55 }
 0x61a   :  { %v749_v40 = vpop.xlane.xlu0 %748 }
 0x61b   :  { %v750_v43 = vadd.f32 %v1048_v27, %v749_v40 }
 0x61d   :  { %v974_v45 = vrot.slane %v750_v43, 5 }
 0x65d   :  { %v824_v56 = vpop.f32.mrb[6].mxu1 }
 0x65e   :  { %v829_v57 = vrot.slane %v824_v56, 2  ;;  %v830_v58 = vrot.slane %v824_v56, 3  ;;  %v1180_v59 = vpop.f32.mrb[7].mxu1 }
 0x660   :  { %v833_v60 = vadd.f32 %v829_v57, %v1489_v22  ;;  %v834_v61 = vadd.f32 %v830_v58, %v1491_v23 }
 0x662   :  { %1277 = vtanh.f32 %v833_v60 }
 0x663   :  { %1279 = vtanh.f32 %v834_v61 }
 0x66c   :  { %v1278_v62 = vpop.eup %1277 }
 0x66d   :  { %v1280_v63 = vpop.eup %1279  ;;  %v852_v0 = vrot.slane %v1278_v62, 6  ;;  %v837_v7 = vmul.f32 %v1278_v62, %v1498_v31 }
 0x66e   :  { %v853_v3 = vrot.slane %v1280_v63, 5  ;;  %v838_v4 = vmul.f32 %v1280_v63, %v1498_v31 }
 0x670   :  { %v854_v5 = vsel %vm245_vm4, %v853_v3, %v852_v0  ;;  %v841_v8 = vrot.slane %v838_v4, 7  ;;  %vm248_vm4 = vcmask 254976  }
 0x671   :  { %1190 = vmatmul.mubr.msk.f32.vlgmr.msra.gmra.mrb[8].mxu0 %vm152_vm3, %v854_v5  ;;  %vm947_vm3 = vcmask 253952  }
 0x672   :  { %v843_v9 = vsel %vm842_vm15, %v841_v8, %v837_v7 }
 0x673   :  { %v846_v10 = vsel %vm845_vm0, %v843_v9, 0.0 }
 0x674   :  { %847 = vadd.xlane.f32.xlu1 %v846_v10 }
 0x701   :  { %v848_v36 = vpop.xlane.xlu1 %847 }
 0x702   :  { %v849_v42 = vadd.f32 %v1048_v27, %v848_v36 }
 0x704   :  { %v979_v44 = vrot.slane %v849_v42, 6 }
 0x744   :  { %v923_v12 = vpop.f32.mrb[8].mxu0 }
 0x745   :  { %v928_v13 = vrot.slane %v923_v12, 1  ;;  %v929_v14 = vrot.slane %v923_v12, 2  ;;  %v1191_v15 = vpop.f32.mrb[9].mxu0 }
 0x747   :  { %v932_v16 = vadd.f32 %v928_v13, %v1489_v22  ;;  %v933_v17 = vadd.f32 %v929_v14, %v1491_v23  ;;  %v249_v23 = vsel %vm248_vm4, %v1508_v37, 0.0  ;;  %v969_v37 = vrot.slane %v651_v39, 4 }
 0x749   :  { %1281 = vtanh.f32 %v932_v16 }
 0x74a   :  { %1283 = vtanh.f32 %v933_v17 }
 0x753   :  { %v1282_v18 = vpop.eup %1281 }
 0x754   :  { %v1284_v19 = vpop.eup %1283  ;;  %v936_v20 = vmul.f32 %v1282_v18, %v1498_v31  ;;  %1012 = vst.msk [vmem:[#allocation7 - $0x7] sm:$0x80] %vm943_vm1, %v1282_v18 }
 0x755   :  { %v937_v21 = vmul.f32 %v1284_v19, %v1498_v31  ;;  %v1009_v24 = vrot.slane %v1284_v19, 7  ;;  %v453_v31 = vadd.f32 %v1048_v27, %v452_v32 }
 0x756   :  { %v944_v25 = vsel %vm943_vm1, %v936_v20, 0.0 }
 0x757   :  { %945 = vadd.xlane.f32.xlu0 %v944_v25  ;;  %v940_v26 = vrot.slane %v937_v21, 7  ;;  %1013 = vst.msk [vmem:[#allocation7 + $0x1] sm:$0x1] %vm947_vm3, %v1009_v24  ;;  %v959_v41 = vrot.slane %v453_v31, 2 }
 0x759   :  { %v948_v22 = vsel %vm947_vm3, %v940_v26, 0.0 }
 0x75a   :  { %949 = vadd.xlane.f32.xlu1 %v948_v22 }
 0x75b   :  { %250 = vadd.xlane.f32.xlu0 %v249_v23 }
 0x76b   :  { %955 = vrot.lane.b32.xlu1 %v954_v34, %s1361_s6 }
 0x76f   :  { %965 = vrot.lane.b32.xlu1 %v964_v38, %s1362_s15 }
 0x771   :  { %960 = vrot.lane.b32.xlu0 %v959_v41, %s1363_s16 }
 0x773   :  { %970 = vrot.lane.b32.xlu1 %v969_v37, %s1364_s17 }
 0x775   :  { %980 = vrot.lane.b32.xlu0 %v979_v44, %s1365_s18 }
 0x777   :  { %975 = vrot.lane.b32.xlu1 %v974_v45, %s1366_s19 }
 0x778   :  { %1318 = shalt.err (!%p1315_p12)
}
 0x779   :  { %s1319_s24 = scalar_lea.hbm %s1610_s9, 32 }
 0x77a   :  { %p1320_p13 = scmp.ne.s32.totalorder %s1610_s9, %s1319_s24  ;;  %p1323_p0 = scmp.lt.u32.totalorder %s1319_s24, %s1610_s9 }
 0x77c   :  { %p1325_p1 = pnand %p1323_p0, %p1320_p13 }
 0x77e   :  { %1328 = shalt.err (!%p1325_p1)
}
 0x77f   :  { %1033 = dma.vmem_to_hbm [thread:$0]  %s1031_s20, 32, %s1610_s9, [#allocation8]   ;;  %vm985_vm5 = vcmask 1040384   ;;  %vm992_vm6 = vcmask 7168   ;;  %vm994_vm7 = vcmask 15360   ;;  %vm996_vm8 = vcmask 23552  }
 0x780   :  { %s1368_s30 = smov 7   ;;  %vm999_vm9 = vcmask 39936   ;;  %vm1001_vm10 = vcmask 48128   ;;  %s1369_s9 = smov [#allocation6]   ;;  %vm1003_vm11 = vcmask 56320   ;;  %vm1005_vm12 = vcmask 58368  }
 0x781   :  { %s1020_s10 = sshll.u32 %s1369_s9, 4  ;;  %s1021_s10 = int_to_ptr.vmem [resolvable:$true] %s1020_s10 }
 0x782   :  { %s1329_s11 = scalar_lea.vmem %s1021_s10, 32  ;;  %p1334_p3 = scmp.lt.s32.totalorder %s1021_s10, %s1021_s10 }
 0x783   :  { %p1330_p2 = scmp.ne.s32.totalorder %s1021_s10, %s1329_s11  ;;  %p1335_p4 = scmp.lt.s32.totalorder %s1329_s11, %s1329_s11 }
 0x785   :  { %p1336_p5 = por %p1335_p4, %p1334_p3 }
 0x787   :  { %p1337_p6 = pnand %p1336_p5, %p1330_p2 }
 0x7e4   :  { %v946_v46 = vpop.xlane.xlu0 %945 }
 0x7e5   :  { %v951_v47 = vadd.f32 %v1048_v27, %v946_v46 }
 0x7e7   :  { %v950_v48 = vpop.xlane.xlu1 %949  ;;  %v986_v6 = vrot.slane %v951_v47, 7 }
 0x7e8   :  { %v952_v49 = vadd.f32 %v1048_v27, %v950_v48  ;;  %v251_v52 = vpop.xlane.xlu0 %250 }
 0x7e9   :  { %v258_v11 = vadd.f32 %v1048_v27, %v251_v52 }
 0x7ea   :  { %v987_v50 = vrot.slane %v952_v49, 7 }
 0x7eb   :  { %v956_v2 = vpop.permute.xlu1 %955 }
 0x7ec   :  { %v988_v51 = vsel %vm985_vm5, %v986_v6, %v987_v50  ;;  %v993_v54 = vsel %vm992_vm6, %v258_v11, %v956_v2  ;;  %v961_v55 = vpop.permute.xlu0 %960 }
 0x7ed   :  { %989 = vrot.lane.b32.xlu1 %v988_v51, %s1368_s30  ;;  %v995_v56 = vsel %vm994_vm7, %v993_v54, %v961_v55 }
 0x7ef   :  { %v966_v1 = vpop.permute.xlu1 %965 }
 0x7f0   :  { %v997_v58 = vsel %vm996_vm8, %v995_v56, %v966_v1  ;;  %v981_v61 = vpop.permute.xlu0 %980 }
 0x7f3   :  { %v971_v53 = vpop.permute.xlu1 %970 }
 0x7f4   :  { %v998_v59 = vsel %vm59_vm2, %v997_v58, %v971_v53 }
 0x7f7   :  { %v976_v57 = vpop.permute.xlu1 %975 }
 0x7f8   :  { %v1000_v60 = vsel %vm999_vm9, %v998_v59, %v976_v57 }
 0x7f9   :  { %v1002_v63 = vsel %vm1001_vm10, %v1000_v60, %v981_v61 }
 0x85f   :  { %v990_v62 = vpop.permute.xlu1 %989 }
 0x860   :  { %v1004_v0 = vsel %vm1003_vm11, %v1002_v63, %v990_v62 }
 0x861   :  { %1006 = vst.msk [vmem:[#allocation6] sm:$0x3] %vm1005_vm12, %v1004_v0 }
 0x862   :  { %1340 = shalt.err (!%p1337_p6)
}
 0x863   :  { %s1341_s1 = scalar_lea.hbm %s1609_s8, 32 }
 0x864   :  { %p1342_p7 = scmp.ne.s32.totalorder %s1609_s8, %s1341_s1  ;;  %p1345_p8 = scmp.lt.u32.totalorder %s1341_s1, %s1609_s8 }
 0x866   :  { %p1347_p9 = pnand %p1345_p8, %p1342_p7 }
 0x868   :  { %1350 = shalt.err (!%p1347_p9)
}
 0x869   :  { %1023 = dma.vmem_to_hbm [thread:$0]  %s1021_s10, 32, %s1609_s8, [#allocation5]  }
 0x86a   :  { %1353 = dma.done.wait [#allocation5], 32  }
 0x86b   :  { %1354 = vsyncadd [#allocation5], 4294967264 }
 0x86c   :  { %1355 = dma.done.wait [#allocation8], 32  }
 0x86d   :  { %1356 = vsyncadd [#allocation8], 4294967264 }
 0x86e   :  { %1040 = vsyncpa [#allocation4], 1 }
 0x86f   :  { %1041 = vsyncpa [#allocation5], 1 }
 0x870   :  { %1042 = vsyncpa [#allocation8], 1 }

</bundles_post_ra>
